<compile_context>
chip_gen: v6e
topology: v6e:2x2x1
jax: 0.10.0
libtpu: 0.0.40
codegen_flags: <defaults>
</compile_context>

<pallas_src>
import jax
import jax.numpy as jnp
from jax.experimental import pallas as pl
from jax.experimental.pallas import tpu as pltpu

BN_EPS = 1e-5


def _round_up(n: int, m: int) -> int:
    return ((n + m - 1) // m) * m


def _pad_axis(a, axis, target, value=0.0):
    pad = target - a.shape[axis]
    if pad <= 0:
        return a
    widths = [(0, 0)] * a.ndim
    widths[axis] = (0, pad)
    return jnp.pad(a, widths, constant_values=value)


# ----------------------------------------------------------------------------
# Fused kernel: per hidden tile k
#   h_k = relu( BN_batch( x @ W1_tile ) )        [B, th]   (stays in VMEM)
#   out += h_k @ W2_tile                         [B, output_dim] (resident)
#   out += bias              (only on the last hidden tile)
# ----------------------------------------------------------------------------
def fused_mlp_kernel(x_ref, w1_ref, gamma_ref, beta_ref, w2_ref, b_ref, o_ref):
    k = pl.program_id(0)

    @pl.when(k == 0)
    def _init():
        o_ref[...] = jnp.zeros_like(o_ref)

    # ---- fc1 tile: [B, th], f32 accumulation on the MXU ----
    h = jnp.dot(x_ref[...], w1_ref[...], preferred_element_type=jnp.float32)

    # ---- BatchNorm1d (train mode: batch stats, biased variance) ----
    # Single pass: E[h] and E[h^2] computed with one elementwise sweep + two
    # sublane reductions (cheaper epilogue than the two-pass form).
    inv_b = 1.0 / h.shape[0]
    mean = jnp.sum(h, axis=0, keepdims=True) * inv_b
    mean_sq = jnp.sum(h * h, axis=0, keepdims=True) * inv_b
    var = jnp.maximum(mean_sq - mean * mean, 0.0)
    h = (h - mean) * jax.lax.rsqrt(var + BN_EPS)
    h = h * gamma_ref[...] + beta_ref[...]

    # ---- ReLU ----
    h = jnp.maximum(h, 0.0)

    # ---- fc2 partial product: accumulate into the resident output block ----
    o_ref[...] += jnp.dot(h, w2_ref[...], preferred_element_type=jnp.float32)

    @pl.when(k == pl.num_programs(0) - 1)
    def _finish():
        o_ref[...] += b_ref[...]


def mlp_forward(x, w1, gamma, beta, w2, b2, *, th=256):
    """y = relu(batchnorm(x @ w1)) @ w2 + b2, fused in one Pallas call.

    x:  [B, input_dim]        w1: [input_dim, hidden]
    gamma/beta: [1, hidden]   w2: [hidden, output_dim]   b2: [1, output_dim]
    th: hidden tile width (use 256 on v6e/v7x, 128 on v5e).
    """
    B, input_dim = x.shape
    hidden = w1.shape[1]
    output_dim = w2.shape[1]

    gamma = gamma.reshape(1, hidden)
    beta = beta.reshape(1, hidden)
    b2 = b2.reshape(1, output_dim)

    # Tile width: multiple of 128 lanes, no bigger than the (padded) hidden dim.
    th = max(128, _round_up(min(th, _round_up(hidden, 128)), 128))
    hidden_p = _round_up(hidden, th)
    n_k = hidden_p // th

    # Zero-pad the hidden axis so every tile is full-size.  Padded W1 columns
    # produce all-zero h columns (BN of a zero column is zero) and padded W2
    # rows are zero, so padding contributes nothing to the output.
    w1_p = _pad_axis(w1, 1, hidden_p)
    gamma_p = _pad_axis(gamma, 1, hidden_p)
    beta_p = _pad_axis(beta, 1, hidden_p)
    w2_p = _pad_axis(w2, 0, hidden_p)

    # Explicit VMEM budget (review: re-derive against v7x's 64 MiB / 32 MiB
    # scoped default).  Double-buffered streams + resident x/out + temporaries.
    f32 = 4
    est = (
        2 * B * input_dim * f32          # x (resident, double-buffered)
        + 2 * input_dim * th * f32       # W1 tile stream
        + 2 * th * output_dim * f32      # W2 tile stream
        + 4 * th * f32                   # gamma / beta tiles
        + 2 * output_dim * f32           # bias
        + B * output_dim * f32           # resident output accumulator
        + 4 * B * th * f32               # in-kernel temporaries (h, stats)
    )
    vmem_limit = int(min(max(2 * est, 32 * 1024 * 1024), 60 * 1024 * 1024))

    # TODO(synk): the hidden axis is a reduction into one resident output block,
    # so it must stay "arbitrary"; feeding both v7x TensorCores would need a
    # second (parallel) grid axis over batch/output tiles plus a cross-tile
    # BN-stat reduction, which is out of scope here.
    return pl.pallas_call(
        fused_mlp_kernel,
        out_shape=jax.ShapeDtypeStruct((B, output_dim), jnp.float32),
        grid_spec=pltpu.PrefetchScalarGridSpec(
            num_scalar_prefetch=0,
            grid=(n_k,),
            in_specs=[
                pl.BlockSpec((B, input_dim), lambda k: (0, 0)),    # x (resident)
                pl.BlockSpec((input_dim, th), lambda k: (0, k)),   # W1 tile
                pl.BlockSpec((1, th), lambda k: (0, k)),           # gamma tile
                pl.BlockSpec((1, th), lambda k: (0, k)),           # beta tile
                pl.BlockSpec((th, output_dim), lambda k: (k, 0)),  # W2 tile
                pl.BlockSpec((1, output_dim), lambda k: (0, 0)),   # bias (resident)
            ],
            out_specs=pl.BlockSpec((B, output_dim), lambda k: (0, 0)),
        ),
        compiler_params=pltpu.CompilerParams(
            dimension_semantics=("arbitrary",),
            vmem_limit_bytes=vmem_limit,
        ),
    )(x, w1_p, gamma_p, beta_p, w2_p, b2)


def mlp_reference(x, w1, gamma, beta, w2, b2):
    h = x @ w1
    mean = jnp.mean(h, axis=0, keepdims=True)
    var = jnp.mean((h - mean) ** 2, axis=0, keepdims=True)
    h = (h - mean) * jax.lax.rsqrt(var + BN_EPS) * gamma.reshape(1, -1) + beta.reshape(1, -1)
    h = jnp.maximum(h, 0.0)
    return h @ w2 + b2.reshape(1, -1)


if __name__ == "__main__":
    # Small shapes consistent with the module's forward (x: [B, input_dim]).
    # HIDDEN=384 is deliberately NOT a multiple of the 256-wide tile to
    # exercise the zero-padding path.
    B, INPUT_DIM, HIDDEN, OUTPUT_DIM = 8, 256, 384, 128

    key = jax.random.PRNGKey(0)
    kx, kw1, kw2, kb2 = jax.random.split(key, 4)

    x = jax.random.normal(kx, (B, INPUT_DIM), dtype=jnp.float32)
    # Deterministic parameter init (shapes from nn.Linear / nn.BatchNorm1d).
    w1 = jax.random.normal(kw1, (INPUT_DIM, HIDDEN), dtype=jnp.float32) * 0.02
    gamma = jnp.ones((1, HIDDEN), dtype=jnp.float32)   # BatchNorm1d.weight init = 1
    beta = jnp.zeros((1, HIDDEN), dtype=jnp.float32)   # BatchNorm1d.bias  init = 0
    w2 = jax.random.normal(kw2, (HIDDEN, OUTPUT_DIM), dtype=jnp.float32) * 0.02
    b2 = jax.random.normal(kb2, (1, OUTPUT_DIM), dtype=jnp.float32) * 0.02

    y = mlp_forward(x, w1, gamma, beta, w2, b2)
    y = jax.block_until_ready(y)

    y_ref = mlp_reference(x, w1, gamma, beta, w2, b2)
    assert y.shape == (B, OUTPUT_DIM)
    assert jnp.allclose(y, y_ref, atol=1e-4, rtol=1e-4), "mismatch vs pure-JAX reference"

    print("KERNEL_OK")
</pallas_src>

<mosaic_0001>
module attributes {stable_mosaic.version = 11 : i64} {
  func.func @fused_mlp_kernel(%arg0: i32, %arg1: memref<8x256xf32, #tpu.memory_space<vmem>>, %arg2: memref<256x256xf32, #tpu.memory_space<vmem>>, %arg3: memref<1x256xf32, #tpu.memory_space<vmem>>, %arg4: memref<1x256xf32, #tpu.memory_space<vmem>>, %arg5: memref<256x128xf32, #tpu.memory_space<vmem>>, %arg6: memref<1x128xf32, #tpu.memory_space<vmem>>, %arg7: memref<8x128xf32, #tpu.memory_space<vmem>>) attributes {dimension_semantics = [#tpu.dimension_semantics<arbitrary>], iteration_bounds = array<i64: 2>, scalar_prefetch = 0 : i64, scratch_operands = 0 : i64, tpu.core_type = #tpu.core_type<tc>, window_params = [{pipeline_mode = #tpu.pipeline_mode<synchronous>, transform_indices = @transform_0, window_bounds = array<i64: 8, 256>}, {transform_indices = @transform_1, window_bounds = array<i64: 256, 256>}, {transform_indices = @transform_2, window_bounds = array<i64: 1, 256>}, {transform_indices = @transform_3, window_bounds = array<i64: 1, 256>}, {transform_indices = @transform_4, window_bounds = array<i64: 256, 128>}, {pipeline_mode = #tpu.pipeline_mode<synchronous>, transform_indices = @transform_5, window_bounds = array<i64: 1, 128>}, {pipeline_mode = #tpu.pipeline_mode<synchronous>, transform_indices = @transform_6, window_bounds = array<i64: 8, 128>}]} {
    %c0_i32 = arith.constant 0 : i32
    %0 = arith.cmpi eq, %arg0, %c0_i32 : i32
    %1 = arith.extui %0 : i1 to i32
    %c0_i32_0 = arith.constant 0 : i32
    %2 = arith.cmpi ne, %1, %c0_i32_0 : i32
    scf.if %2 {
      %cst_23 = arith.constant 0.000000e+00 : f32
      %42 = vector.broadcast %cst_23 : f32 to vector<8x128xf32>
      %c0_24 = arith.constant 0 : index
      %c0_25 = arith.constant 0 : index
      %43 = vector.load %arg7[%c0_24, %c0_25] : memref<8x128xf32, #tpu.memory_space<vmem>>, vector<8x128xf32>
      tpu.vector_store %arg7[%c0_24, %c0_25], %42 {strides = array<i32>} : memref<8x128xf32, #tpu.memory_space<vmem>>, vector<8x128xf32>,
    } else {
    }
    %c0 = arith.constant 0 : index
    %c0_1 = arith.constant 0 : index
    %3 = vector.load %arg1[%c0, %c0_1] : memref<8x256xf32, #tpu.memory_space<vmem>>, vector<8x256xf32>
    %c0_2 = arith.constant 0 : index
    %c0_3 = arith.constant 0 : index
    %4 = vector.load %arg2[%c0_2, %c0_3] : memref<256x256xf32, #tpu.memory_space<vmem>>, vector<256x256xf32>
    %cst = arith.constant dense<0.000000e+00> : vector<8x256xf32>
    %5 = tpu.matmul %3, %4, %cst {dimension_numbers = #tpu.dot_dimension_numbers<[1], [0], [0], [1], [0, 0, 1, 1], [], []>} : vector<8x256xf32>, vector<256x256xf32>, vector<8x256xf32> -> vector<8x256xf32>
    %cst_4 = arith.constant dense<0.000000e+00> : vector<256xf32>
    %6 = vector.multi_reduction <add>, %5, %cst_4 [0] : vector<8x256xf32> to vector<256xf32>
    %7 = vector.shape_cast %6 : vector<256xf32> to vector<1x256xf32>
    %cst_5 = arith.constant 1.250000e-01 : f32
    %8 = vector.broadcast %cst_5 : f32 to vector<1x256xf32>
    %9 = arith.mulf %7, %8 : vector<1x256xf32>
    %10 = arith.mulf %5, %5 : vector<8x256xf32>
    %cst_6 = arith.constant dense<0.000000e+00> : vector<256xf32>
    %11 = vector.multi_reduction <add>, %10, %cst_6 [0] : vector<8x256xf32> to vector<256xf32>
    %12 = vector.shape_cast %11 : vector<256xf32> to vector<1x256xf32>
    %cst_7 = arith.constant 1.250000e-01 : f32
    %13 = vector.broadcast %cst_7 : f32 to vector<1x256xf32>
    %14 = arith.mulf %12, %13 : vector<1x256xf32>
    %15 = arith.mulf %9, %9 : vector<1x256xf32>
    %16 = arith.subf %14, %15 : vector<1x256xf32>
    %cst_8 = arith.constant 0.000000e+00 : f32
    %17 = vector.broadcast %cst_8 : f32 to vector<1x256xf32>
    %18 = arith.maximumf %16, %17 : vector<1x256xf32>
    %19 = vector.broadcast %9 : vector<1x256xf32> to vector<8x256xf32>
    %20 = arith.subf %5, %19 : vector<8x256xf32>
    %cst_9 = arith.constant 9.99999974E-6 : f32
    %21 = vector.broadcast %cst_9 : f32 to vector<1x256xf32>
    %22 = arith.addf %18, %21 : vector<1x256xf32>
    %23 = math.rsqrt %22 : vector<1x256xf32>
    %24 = vector.broadcast %23 : vector<1x256xf32> to vector<8x256xf32>
    %25 = arith.mulf %20, %24 : vector<8x256xf32>
    %c0_10 = arith.constant 0 : index
    %c0_11 = arith.constant 0 : index
    %26 = vector.load %arg3[%c0_10, %c0_11] : memref<1x256xf32, #tpu.memory_space<vmem>>, vector<1x256xf32>
    %27 = vector.broadcast %26 : vector<1x256xf32> to vector<8x256xf32>
    %28 = arith.mulf %25, %27 : vector<8x256xf32>
    %c0_12 = arith.constant 0 : index
    %c0_13 = arith.constant 0 : index
    %29 = vector.load %arg4[%c0_12, %c0_13] : memref<1x256xf32, #tpu.memory_space<vmem>>, vector<1x256xf32>
    %30 = vector.broadcast %29 : vector<1x256xf32> to vector<8x256xf32>
    %31 = arith.addf %28, %30 : vector<8x256xf32>
    %cst_14 = arith.constant 0.000000e+00 : f32
    %32 = vector.broadcast %cst_14 : f32 to vector<8x256xf32>
    %33 = arith.maximumf %31, %32 : vector<8x256xf32>
    %c0_15 = arith.constant 0 : index
    %c0_16 = arith.constant 0 : index
    %34 = vector.load %arg7[%c0_15, %c0_16] : memref<8x128xf32, #tpu.memory_space<vmem>>, vector<8x128xf32>
    %c0_17 = arith.constant 0 : index
    %c0_18 = arith.constant 0 : index
    %35 = vector.load %arg5[%c0_17, %c0_18] : memref<256x128xf32, #tpu.memory_space<vmem>>, vector<256x128xf32>
    %cst_19 = arith.constant dense<0.000000e+00> : vector<8x128xf32>
    %36 = tpu.matmul %33, %35, %cst_19 {dimension_numbers = #tpu.dot_dimension_numbers<[1], [0], [0], [1], [0, 0, 1, 1], [], []>} : vector<8x256xf32>, vector<256x128xf32>, vector<8x128xf32> -> vector<8x128xf32>
    %37 = arith.addf %34, %36 : vector<8x128xf32>
    %c0_20 = arith.constant 0 : index
    %c0_21 = arith.constant 0 : index
    %38 = vector.load %arg7[%c0_20, %c0_21] : memref<8x128xf32, #tpu.memory_space<vmem>>, vector<8x128xf32>
    tpu.vector_store %arg7[%c0_20, %c0_21], %37 {strides = array<i32>} : memref<8x128xf32, #tpu.memory_space<vmem>>, vector<8x128xf32>,
    %c1_i32 = arith.constant 1 : i32
    %39 = arith.cmpi eq, %arg0, %c1_i32 : i32
    %40 = arith.extui %39 : i1 to i32
    %c0_i32_22 = arith.constant 0 : i32
    %41 = arith.cmpi ne, %40, %c0_i32_22 : i32
    scf.if %41 {
      %c0_23 = arith.constant 0 : index
      %c0_24 = arith.constant 0 : index
      %42 = vector.load %arg7[%c0_23, %c0_24] : memref<8x128xf32, #tpu.memory_space<vmem>>, vector<8x128xf32>
      %c0_25 = arith.constant 0 : index
      %c0_26 = arith.constant 0 : index
      %43 = vector.load %arg6[%c0_25, %c0_26] : memref<1x128xf32, #tpu.memory_space<vmem>>, vector<1x128xf32>
      %44 = vector.broadcast %43 : vector<1x128xf32> to vector<8x128xf32>
      %45 = arith.addf %42, %44 : vector<8x128xf32>
      %c0_27 = arith.constant 0 : index
      %c0_28 = arith.constant 0 : index
      %46 = vector.load %arg7[%c0_27, %c0_28] : memref<8x128xf32, #tpu.memory_space<vmem>>, vector<8x128xf32>
      tpu.vector_store %arg7[%c0_27, %c0_28], %45 {strides = array<i32>} : memref<8x128xf32, #tpu.memory_space<vmem>>, vector<8x128xf32>,
    } else {
    }
    return
  }
  func.func @transform_0(%arg0: i32) -> (i32, i32) {
    %c0_i32 = arith.constant 0 : i32
    %c0_i32_0 = arith.constant 0 : i32
    %c0_i32_1 = arith.constant 0 : i32
    return %c0_i32, %c0_i32_0 : i32, i32
  }
  func.func @transform_1(%arg0: i32) -> (i32, i32) {
    %c0_i32 = arith.constant 0 : i32
    %c0_i32_0 = arith.constant 0 : i32
    return %c0_i32, %arg0 : i32, i32
  }
  func.func @transform_2(%arg0: i32) -> (i32, i32) {
    %c0_i32 = arith.constant 0 : i32
    %c0_i32_0 = arith.constant 0 : i32
    return %c0_i32, %arg0 : i32, i32
  }
  func.func @transform_3(%arg0: i32) -> (i32, i32) {
    %c0_i32 = arith.constant 0 : i32
    %c0_i32_0 = arith.constant 0 : i32
    return %c0_i32, %arg0 : i32, i32
  }
  func.func @transform_4(%arg0: i32) -> (i32, i32) {
    %c0_i32 = arith.constant 0 : i32
    %c0_i32_0 = arith.constant 0 : i32
    return %arg0, %c0_i32 : i32, i32
  }
  func.func @transform_5(%arg0: i32) -> (i32, i32) {
    %c0_i32 = arith.constant 0 : i32
    %c0_i32_0 = arith.constant 0 : i32
    %c0_i32_1 = arith.constant 0 : i32
    return %c0_i32, %c0_i32_0 : i32, i32
  }
  func.func @transform_6(%arg0: i32) -> (i32, i32) {
    %c0_i32 = arith.constant 0 : i32
    %c0_i32_0 = arith.constant 0 : i32
    %c0_i32_1 = arith.constant 0 : i32
    return %c0_i32, %c0_i32_0 : i32, i32
  }
}

</mosaic_0001>

<bundles_post_ra>
// kernel: tpu_custom_call.1
= control target key start
LH: loop header
LB: loop body
LE: loop exit
PB: predicated region body
PF: predicated region fallthrough
CT: control target
= control target key end

     0   :  { %11 = vsyncpa [#allocation3], 0  ;;  %s1530_s0 = inlined_call_operand.hbm [shape: f32[8,256], index: 0, kind: input, shape index: {}]   ;;  %s1531_s1 = inlined_call_operand.hbm [shape: f32[256,512], index: 1, kind: input, shape index: {}]   ;;  %s1532_s2 = inlined_call_operand.hbm [shape: f32[1,512], index: 2, kind: input, shape index: {}]   ;;  %s1533_s3 = inlined_call_operand.vmem [shape: f32[1,512], index: 3, kind: input, shape index: {}]   ;;  %s1534_s4 = inlined_call_operand.hbm [shape: f32[512,128], index: 4, kind: input, shape index: {}]   ;;  %s1535_s5 = inlined_call_operand.vmem [shape: f32[1,128], index: 5, kind: input, shape index: {}]   ;;  %s1536_s6 = inlined_call_operand.hbm [shape: f32[8,128], index: 6, kind: output, shape index: {}]  }
   0x1   :  { %12 = vsyncpa [#allocation6], 0 }
   0x2   :  { %14 = vsyncpa [#allocation6 + $0x1], 0 }
   0x3   :  { %15 = vsyncpa [#allocation9], 0 }
   0x4   :  { %17 = vsyncpa [#allocation9 + $0x1], 0 }
   0x5   :  { %18 = vsyncpa [#allocation4], 0  ;;  %s1193_s21 = smov 0   ;;  %s1195_s22 = smov 0  }
   0x6   :  { %s1197_s23 = smov 0   ;;  %s1199_s24 = smov 0  }
   0x7 LB: > { %s1214_s25 = sadd.s32 1, %s1145_s24   ;;  %s52_s26 = sadd.s32 1, %s1141_s23  ;;  %s1145_s24 = sphi %s1199_s24, %s1553_s24   ;;  %s1141_s23 = sphi %s1197_s23, %s1552_s23   ;;  %s1137_s22 = sphi %s1195_s22, %s1551_s22   ;;  %s1133_s21 = sphi %s1193_s21, %s1550_s21  }
   0x8   : > { %s49_s27 = ssub.s32 %s1145_s24, %s1214_s25  ;;  %p59_p0 = scmp.ne.s32.totalorder %s1141_s23, %s1137_s22 }
   0x9   : > { %p50_p1 = scmp.eq.s32.totalorder %s49_s27, 0  ;;  %p60_p2 = scmp.eq.s32.totalorder %s1145_s24, 0 }
   0xa   : > { %p917_p3 = scmp.lt.s32.totalorder %s1145_s24, 2  ;;  %s223_s29 = sand.u32 1, %s1145_s24  }
   0xb   : > { %s1224_s28 = scalar_select %p50_p1, %s1141_s23, %s52_s26  }
   0xc   : > { %p61_p4 = por %p60_p2, %p59_p0  ;;  %s1228_s30 = sand.u32 1, %s1141_s23  }
   0xd   : > { %s828_s7 = sshll.u32 %s1228_s30, 9  ;;  %s850_s8 = sshll.u32 %s1145_s24, 8 }
   0xe   : > { %s1235_s11 = scalar_lea.hbm %s1531_s1, %s850_s8  ;;  %s227_s12 = scalar_lea.vmem [#allocation5], %s828_s7 }
   0xf   : > { %s234_s13 = sshll.u32 %s227_s12, 4  ;;  %p1237_p5 = pnand %p917_p3, %p61_p4  ;;  %s1241_s13 = int_to_ptr.vmem [resolvable:$true] %s234_s13 }
  0x10   : > { %s1243_s15 = scalar_lea.sflag [#allocation6], %s223_s29  ;;  %s965_s16 = scalar_lea.hbm %s1235_s11, 8192 }
  0x11   : > { %p966_p6 = scmp.ne.s32.totalorder %s1235_s11, %s965_s16  ;;  %p1249_p7 = pneg %p1237_p5 }
  0x12   : > { %s970_s20 = scalar_lea.hbm %s1531_s1, 16384  ;;  %p971_p10 = scmp.lt.s32.totalorder %s1235_s11, %s1531_s1 }
  0x13   : > { %p968_p8 = pnand %p1249_p7, %p966_p6  ;;  %p972_p11 = scmp.lt.s32.totalorder %s970_s20, %s965_s16 }
  0x15   : > { %p969_p9 = pneg %p968_p8  ;;  %p973_p12 = por %p972_p11, %p971_p10 }
  0x17   : > { %p974_p13 = pnand %p973_p12, %p969_p9 }
  0x19   : > { %977 = shalt.err (!%p974_p13)
}
  0x1a   : > { %s978_s29 = scalar_lea.vmem %s1241_s13, 8192  ;;  %s1147_s7 = smov [#allocation5]  }
  0x1b   : > { %p979_p0 = scmp.ne.s32.totalorder %s1241_s13, %s978_s29  ;;  %s983_s8 = sshll.u32 %s1147_s7, 4  ;;  %s984_s8 = int_to_ptr.vmem [resolvable:$false] %s983_s8 }
  0x1c   : > { %s985_s9 = scalar_lea.vmem %s984_s8, 16384  ;;  %p986_p3 = scmp.lt.s32.totalorder %s1241_s13, %s984_s8 }
  0x1d   : > { %p981_p1 = pnand %p979_p0, %p1249_p7  ;;  %p987_p4 = scmp.lt.s32.totalorder %s985_s9, %s978_s29 }
  0x1f   : > { %p982_p2 = pneg %p981_p1  ;;  %p988_p6 = por %p987_p4, %p986_p3 }
  0x21   : > { %p989_p8 = pnand %p988_p6, %p982_p2 }
  0x23   : > { %992 = shalt.err (!%p989_p8)
}
  0x24   : > { %s1148_s10 = smov 512   ;;  %s1149_s12 = smov 256  }
  0x25   : > { %s1150_s16 = smov 16   ;;  %s1273_s18 = sadd.s32 4294967295, %s1145_s24  }
  0x26   : > { %909 = dma.hbm_to_vmem [thread:$0]  (!%p1237_p5), %s1235_s11, 8192, %s1241_s13, %s1243_s15, %s1148_s10, %s1149_s12, %s1150_s16  }
  0x27   : > { %p65_p9 = scmp.ne.s32.totalorder %s1137_s22, %s1133_s21  ;;  %p1537_p10 = scmp.eq.s32.totalorder %s1273_s18, 0 }
  0x28   : > { %p825_p11 = scmp.ge.s32.totalorder %s1145_s24, 1  ;;  %p196_p12 = scmp.lt.s32.totalorder %s1145_s24, 3 }
  0x29   : > { %p1282_p13 = por %p1537_p10, %p65_p9  ;;  %s1151_s11 = smov [#allocation2]  }
  0x2a   : > { %p1287_p1 = pnand %p825_p11, %p196_p12  ;;  %s209_s13 = sshll.u32 %s1151_s11, 4  ;;  %s210_s13 = int_to_ptr.vmem [resolvable:$true] %s209_s13 }
  0x2b   : > { %s1542_s19 = scalar_select %p1282_p13, 1, 0 }
  0x2c   : > { %s1543_s20 = scalar_select %p1287_p1, 1, 0 }
  0x2d   : > { %s831_s26 = sshll.u32 %s1228_s30, 1  ;;  %p902_p2 = pneg %p1287_p1 }
  0x2e   : > { %s851_s21 = sshll.u32 %s1145_s24, 5  ;;  %s248_s9 = scalar_lea.vmem [#allocation7], %s831_s26 }
  0x2f   : > { %p1297_p3 = pnand %p902_p2, %p1537_p10  ;;  %s1304_s8 = scalar_lea.hbm %s1532_s2, %s851_s21 }
  0x30   : > { %s256_s10 = sshll.u32 %s248_s9, 4  ;;  %s1004_s12 = scalar_lea.vmem %s210_s13, 256  ;;  %s1306_s10 = int_to_ptr.vmem [resolvable:$true] %s256_s10 }
  0x31   : > { %p995_p4 = pneg %p1297_p3  ;;  %p1005_p6 = scmp.ne.s32.totalorder %s210_s13, %s1004_s12 }
  0x32   : > { %p1012_p11 = scmp.lt.s32.totalorder %s210_s13, %s210_s13  ;;  %p1013_p12 = scmp.lt.s32.totalorder %s1004_s12, %s1004_s12 }
  0x33   : > { %p1007_p8 = pnand %p1005_p6, %p995_p4 }
  0x34   : > { %p1014_p2 = por %p1013_p12, %p1012_p11 }
  0x35   : > { %p1008_p9 = pneg %p1007_p8 }
  0x37   : > { %p1015_p0 = pnand %p1014_p2, %p1008_p9 }
  0x39   : > { %1018 = shalt.err (!%p1015_p0)
}
  0x3a   : > { %905 = dma.hbm_to_vmem [thread:$0]  (!%p1297_p3), %s1530_s0, 256, %s210_s13, [#allocation3]  }
  0x3b   : > { %s1019_s26 = scalar_lea.hbm %s1304_s8, 32  ;;  %s1024_s7 = scalar_lea.hbm %s1532_s2, 64 }
  0x3c   : > { %p1020_p10 = scmp.ne.s32.totalorder %s1304_s8, %s1019_s26  ;;  %p1025_p0 = scmp.lt.s32.totalorder %s1304_s8, %s1532_s2 }
  0x3d   : > { %p1026_p8 = scmp.lt.s32.totalorder %s1024_s7, %s1019_s26 }
  0x3e   : > { %p1022_p4 = pnand %p1020_p10, %p1249_p7 }
  0x3f   : > { %p1027_p9 = por %p1026_p8, %p1025_p0 }
  0x40   : > { %p1023_p6 = pneg %p1022_p4 }
  0x42   : > { %p1028_p11 = pnand %p1027_p9, %p1023_p6 }
  0x44   : > { %1031 = shalt.err (!%p1028_p11)
}
  0x45   : > { %s1032_s13 = scalar_lea.vmem %s1306_s10, 32  ;;  %s1152_s27 = smov [#allocation7]  }
  0x46   : > { %p1033_p3 = scmp.ne.s32.totalorder %s1306_s10, %s1032_s13  ;;  %s1037_s16 = sshll.u32 %s1152_s27, 4  ;;  %s1038_s16 = int_to_ptr.vmem [resolvable:$false] %s1037_s16 }
  0x47   : > { %s1039_s11 = scalar_lea.vmem %s1038_s16, 64  ;;  %p1040_p2 = scmp.lt.s32.totalorder %s1306_s10, %s1038_s16 }
  0x48   : > { %p1035_p10 = pnand %p1033_p3, %p1249_p7  ;;  %p1041_p4 = scmp.lt.s32.totalorder %s1039_s11, %s1032_s13 }
  0x4a   : > { %p1036_p12 = pneg %p1035_p10  ;;  %p1042_p13 = por %p1041_p4, %p1040_p2 }
  0x4c   : > { %p1043_p1 = pnand %p1042_p13, %p1036_p12 }
  0x4e   : > { %1046 = shalt.err (!%p1043_p1)
}
  0x4f   : > { %912 = dma.hbm_to_vmem [thread:$0]  (!%p1237_p5), %s1304_s8, 32, %s1306_s10, %s1243_s15  }
  0x50   : > { %s834_s26 = sshll.u32 %s1228_s30, 8  ;;  %s852_s21 = sshll.u32 %s1145_s24, 12 }
  0x51   : > { %s1341_s9 = scalar_lea.hbm %s1534_s4, %s852_s21  ;;  %s275_s12 = scalar_lea.vmem [#allocation8], %s834_s26 }
  0x52   : > { %s282_s13 = sshll.u32 %s275_s12, 4  ;;  %s272_s27 = scalar_lea.sflag [#allocation9], %s1228_s30  ;;  %s1343_s13 = int_to_ptr.vmem [resolvable:$true] %s282_s13 }
  0x53   : > { %s1047_s16 = scalar_lea.hbm %s1341_s9, 4096  ;;  %s1052_s8 = scalar_lea.hbm %s1534_s4, 8192 }
  0x54   : > { %p1048_p13 = scmp.ne.s32.totalorder %s1341_s9, %s1047_s16  ;;  %p1053_p0 = scmp.lt.s32.totalorder %s1341_s9, %s1534_s4 }
  0x55   : > { %p1054_p8 = scmp.lt.s32.totalorder %s1052_s8, %s1047_s16 }
  0x56   : > { %p1050_p1 = pnand %p1048_p13, %p1249_p7 }
  0x57   : > { %p1055_p9 = por %p1054_p8, %p1053_p0 }
  0x58   : > { %p1051_p6 = pneg %p1050_p1 }
  0x5a   : > { %p1056_p11 = pnand %p1055_p9, %p1051_p6 }
  0x5c   : > { %1059 = shalt.err (!%p1056_p11)
}
  0x5d   : > { %s1060_s26 = scalar_lea.vmem %s1343_s13, 4096  ;;  %s1153_s21 = smov [#allocation8]  }
  0x5e   : > { %p1061_p3 = scmp.ne.s32.totalorder %s1343_s13, %s1060_s26  ;;  %s1065_s29 = sshll.u32 %s1153_s21, 4  ;;  %s1066_s29 = int_to_ptr.vmem [resolvable:$false] %s1065_s29 }
  0x5f   : > { %s1067_s7 = scalar_lea.vmem %s1066_s29, 8192  ;;  %p1068_p2 = scmp.lt.s32.totalorder %s1343_s13, %s1066_s29 }
  0x60   : > { %p1063_p10 = pnand %p1061_p3, %p1249_p7  ;;  %p1069_p4 = scmp.lt.s32.totalorder %s1067_s7, %s1060_s26 }
  0x62   : > { %p1064_p12 = pneg %p1063_p10  ;;  %p1070_p13 = por %p1069_p4, %p1068_p2 }
  0x64   : > { %p1071_p1 = pnand %p1070_p13, %p1064_p12 }
  0x66   : > { %1074 = shalt.err (!%p1071_p1)
}
  0x67   : > { %s1154_s12 = smov 128   ;;  %s1155_s16 = smov 8  }
  0x68   : > { %915 = dma.hbm_to_vmem [thread:$0]  (!%p1237_p5), %s1341_s9, 4096, %s1343_s13, %s272_s27, %s1154_s12, %s1154_s12, %s1155_s16  }
  0x69   : > { %p1545_p7 = scmp.ne.s32.totalorder %s1543_s20, 0 }
  0x6a   : > { %p1546_p6 = scmp.eq.s32.totalorder (!%p1545_p7), %s1273_s18, 0 }
  0x6b   : > { %294 = sbr.rel (%p1545_p7) target bundleno = 661 (0x295), region = 44 }
  0x70   : > { %1116 = dma.done.wait (%p1546_p6), [#allocation3], 256   ;;  %p1547_p0 = pmov %p1546_p6 }
  0x71   : > { %s300_s17 = sand.u32 1, %s1273_s18   ;;  %s302_s15 = sand.u32 1, %s1137_s22  }
  0x72   : > { %1118 = vsyncadd (%p1547_p0), [#allocation3], 4294967040  ;;  %s839_s24 = sshll.u32 %s302_s15, 9  ;;  %s301_s8 = scalar_lea.sflag [#allocation6], %s300_s17 }
  0x73   : > { %s1376_s10 = scalar_lea.vmem [#allocation5], %s839_s24  ;;  %p1548_p8 = scmp.ne.s32.totalorder %s1542_s19, 0 }
  0x75   : > { %1120 = dma.done.wait (%p1548_p8), %s301_s8, 8224  }
  0x76   : > { %1122 = vsyncadd (%p1548_p8), %s301_s8, 4294959072  ;;  %s840_s30 = sshll.u32 %s302_s15, 1  ;;  %s841_s14 = sshll.u32 %s302_s15, 8 }
  0x77   : > { %s1382_s20 = scalar_lea.vmem [#allocation7], %s840_s30  ;;  %s319_s9 = scalar_lea.sflag [#allocation9], %s302_s15 }
  0x78   : > { %s1384_s13 = scalar_lea.vmem [#allocation8], %s841_s14 }
  0x79   : > { %1124 = dma.done.wait (%p1548_p8), %s319_s9, 4096  }
  0x7a   : > { %1126 = vsyncadd (%p1548_p8), %s319_s9, 4294963200  ;;  %s842_s27 = sshll.u32 %s1273_s18, 1  ;;  %p1549_p9 = scmp.ne.s32.totalorder %s1273_s18, 0 }
  0x7b   : > { %p363_p5 = scmp.lt.s32.totalorder %s842_s27, 3 }
  0x7c   : > { %371 = sbr.rel (%p1549_p9) target bundleno = 131 (0x83), region = 64 }
  0x7d   : > { %s1555_s27 = smov (!%p363_p5, %s842_s27), 3 }
  0x7e   : > { %s365_s21 = scalar_lea.vmem %s1533_s3, %s1555_s27 }
  0x81   : > { %v1156_v0 = vmov 0.0  }
  0x82   : > { %372 = vst [vmem:[#allocation10] sm:$0xff] %v1156_v0 }
  0x83 PF: > { %v406_v1 = vld [vmem:[%s1376_s10 + $0xf8] sm:$0xff]  ;;  %v405_v2 = vld [vmem:[%s1376_s10 + $0xf0] sm:$0xff]  ;;  %v404_v3 = vld [vmem:[%s1376_s10 + $0xe8] sm:$0xff]  ;;  %p844_p11 = scmp.ne.s32.totalorder %s1273_s18, 1 }
  0x84   : > { %439 = vmatprep.subr.mxu0 %v406_v1  ;;  %v403_v4 = vld [vmem:[%s1376_s10 + $0xe0] sm:$0xff]  ;;  %v402_v5 = vld [vmem:[%s1376_s10 + $0xd8] sm:$0xff]  ;;  %v401_v6 = vld [vmem:[%s1376_s10 + $0xd0] sm:$0xff] }
  0x85   : > { %440 = vmatpush1.msra.mxu0 %v405_v2  ;;  %v400_v7 = vld [vmem:[%s1376_s10 + $0xc8] sm:$0xff]  ;;  %v399_v8 = vld [vmem:[%s1376_s10 + $0xc0] sm:$0xff]  ;;  %v398_v9 = vld [vmem:[%s1376_s10 + $0xb8] sm:$0xff] }
  0x86   : > { %441 = vmatprep.subr.mxu0 %v404_v3  ;;  %v397_v10 = vld [vmem:[%s1376_s10 + $0xb0] sm:$0xff]  ;;  %v396_v11 = vld [vmem:[%s1376_s10 + $0xa8] sm:$0xff]  ;;  %v395_v12 = vld [vmem:[%s1376_s10 + $0xa0] sm:$0xff] }
  0x87   : > { %442 = vmatpush1.msra.mxu0 %v403_v4  ;;  %v394_v13 = vld [vmem:[%s1376_s10 + $0x98] sm:$0xff]  ;;  %v393_v14 = vld [vmem:[%s1376_s10 + $0x90] sm:$0xff]  ;;  %v392_v15 = vld [vmem:[%s1376_s10 + $0x88] sm:$0xff] }
  0x88   : > { %443 = vmatprep.subr.mxu0 %v402_v5  ;;  %v391_v16 = vld [vmem:[%s1376_s10 + $0x80] sm:$0xff]  ;;  %v390_v17 = vld [vmem:[%s1376_s10 + $0x78] sm:$0xff]  ;;  %v389_v18 = vld [vmem:[%s1376_s10 + $0x70] sm:$0xff] }
  0x89   : > { %444 = vmatpush1.msra.mxu0 %v401_v6  ;;  %v388_v19 = vld [vmem:[%s1376_s10 + $0x68] sm:$0xff]  ;;  %v387_v20 = vld [vmem:[%s1376_s10 + $0x60] sm:$0xff]  ;;  %v386_v21 = vld [vmem:[%s1376_s10 + $0x58] sm:$0xff] }
  0x8a   : > { %445 = vmatprep.subr.mxu0 %v400_v7  ;;  %v385_v22 = vld [vmem:[%s1376_s10 + $0x50] sm:$0xff]  ;;  %v384_v23 = vld [vmem:[%s1376_s10 + $0x48] sm:$0xff]  ;;  %v383_v24 = vld [vmem:[%s1376_s10 + $0x40] sm:$0xff] }
  0x8b   : > { %446 = vmatpush1.msra.mxu0 %v399_v8  ;;  %v374_v25 = vld [vmem:[#allocation2 + $0x8] sm:$0xff]  ;;  %v381_v27 = vld [vmem:[%s1376_s10 + $0x30] sm:$0xff]  ;;  %v380_v28 = vld [vmem:[%s1376_s10 + $0x28] sm:$0xff] }
  0x8c   : > { %447 = vmatprep.subr.mxu0 %v398_v9  ;;  %v382_v26 = vld [vmem:[%s1376_s10 + $0x38] sm:$0xff]  ;;  %503 = vmatprep.mubr.f32.mxu0 %v374_v25  ;;  %v379_v29 = vld [vmem:[%s1376_s10 + $0x20] sm:$0xff]  ;;  %v377_v31 = vld [vmem:[%s1376_s10 + $0x10] sm:$0xff] }
  0x8d   : > { %448 = vmatpush1.msra.mxu0 %v397_v10  ;;  %v378_v30 = vld [vmem:[%s1376_s10 + $0x18] sm:$0xff]  ;;  %v376_v32 = vld [vmem:[%s1376_s10 + $0x8] sm:$0xff]  ;;  %v375_v33 = vld [vmem:[%s1376_s10] sm:$0xff] }
  0x8e   : > { %449 = vmatprep.subr.mxu0 %v396_v11  ;;  %v438_v34 = vld [vmem:[%s1376_s10 + $0x1f8] sm:$0xff]  ;;  %v437_v35 = vld [vmem:[%s1376_s10 + $0x1f0] sm:$0xff]  ;;  %v436_v36 = vld [vmem:[%s1376_s10 + $0x1e8] sm:$0xff] }
  0x8f   : > { %450 = vmatpush1.msra.mxu0 %v395_v12  ;;  %v435_v37 = vld [vmem:[%s1376_s10 + $0x1e0] sm:$0xff]  ;;  %v434_v38 = vld [vmem:[%s1376_s10 + $0x1d8] sm:$0xff]  ;;  %v433_v39 = vld [vmem:[%s1376_s10 + $0x1d0] sm:$0xff] }
  0x90   : > { %451 = vmatprep.subr.mxu0 %v394_v13  ;;  %v432_v40 = vld [vmem:[%s1376_s10 + $0x1c8] sm:$0xff]  ;;  %v431_v41 = vld [vmem:[%s1376_s10 + $0x1c0] sm:$0xff]  ;;  %v430_v42 = vld [vmem:[%s1376_s10 + $0x1b8] sm:$0xff] }
  0x91   : > { %452 = vmatpush1.msra.mxu0 %v393_v14  ;;  %v429_v43 = vld [vmem:[%s1376_s10 + $0x1b0] sm:$0xff]  ;;  %v428_v44 = vld [vmem:[%s1376_s10 + $0x1a8] sm:$0xff]  ;;  %v427_v45 = vld [vmem:[%s1376_s10 + $0x1a0] sm:$0xff] }
  0x92   : > { %453 = vmatprep.subr.mxu0 %v392_v15  ;;  %v426_v46 = vld [vmem:[%s1376_s10 + $0x198] sm:$0xff]  ;;  %v425_v47 = vld [vmem:[%s1376_s10 + $0x190] sm:$0xff]  ;;  %v424_v48 = vld [vmem:[%s1376_s10 + $0x188] sm:$0xff] }
  0x93   : > { %454 = vmatpush1.msra.mxu0 %v391_v16  ;;  %v423_v49 = vld [vmem:[%s1376_s10 + $0x180] sm:$0xff]  ;;  %v422_v50 = vld [vmem:[%s1376_s10 + $0x178] sm:$0xff]  ;;  %v421_v51 = vld [vmem:[%s1376_s10 + $0x170] sm:$0xff] }
  0x94   : > { %455 = vmatprep.subr.mxu0 %v390_v17  ;;  %v420_v52 = vld [vmem:[%s1376_s10 + $0x168] sm:$0xff]  ;;  %v419_v53 = vld [vmem:[%s1376_s10 + $0x160] sm:$0xff]  ;;  %v418_v54 = vld [vmem:[%s1376_s10 + $0x158] sm:$0xff] }
  0x95   : > { %456 = vmatpush1.msra.mxu0 %v389_v18  ;;  %v417_v55 = vld [vmem:[%s1376_s10 + $0x150] sm:$0xff]  ;;  %v416_v56 = vld [vmem:[%s1376_s10 + $0x148] sm:$0xff]  ;;  %v415_v57 = vld [vmem:[%s1376_s10 + $0x140] sm:$0xff] }
  0x96   : > { %457 = vmatprep.subr.mxu0 %v388_v19  ;;  %v414_v58 = vld [vmem:[%s1376_s10 + $0x138] sm:$0xff]  ;;  %v413_v59 = vld [vmem:[%s1376_s10 + $0x130] sm:$0xff]  ;;  %v412_v60 = vld [vmem:[%s1376_s10 + $0x128] sm:$0xff] }
  0x97   : > { %458 = vmatpush1.msra.mxu0 %v387_v20  ;;  %v411_v61 = vld [vmem:[%s1376_s10 + $0x120] sm:$0xff]  ;;  %v410_v62 = vld [vmem:[%s1376_s10 + $0x118] sm:$0xff]  ;;  %v409_v63 = vld [vmem:[%s1376_s10 + $0x110] sm:$0xff] }
  0x98   : > { %459 = vmatprep.subr.mxu0 %v386_v21  ;;  %v408_v0 = vld [vmem:[%s1376_s10 + $0x108] sm:$0xff]  ;;  %v407_v1 = vld [vmem:[%s1376_s10 + $0x100] sm:$0xff]  ;;  %v373_v2 = vld [vmem:[#allocation2] sm:$0xff] }
  0x99   : > { %460 = vmatpush1.msra.mxu0 %v385_v22  ;;  %v616_v3 = vld [vmem:[%s1384_s13 + $0xf8] sm:$0xff]  ;;  %v615_v5 = vld [vmem:[%s1384_s13 + $0xf0] sm:$0xff]  ;;  %v614_v7 = vld [vmem:[%s1384_s13 + $0xe8] sm:$0xff] }
  0x9a   : > { %461 = vmatprep.subr.mxu0 %v384_v23  ;;  %853 = vmatprep.subr.mxu1 %v616_v3  ;;  %v600_v4 = vld [vmem:[%s1384_s13 + $0x78] sm:$0xff]  ;;  %v599_v6 = vld [vmem:[%s1384_s13 + $0x70] sm:$0xff]  ;;  %v598_v8 = vld [vmem:[%s1384_s13 + $0x68] sm:$0xff] }
  0x9b   : > { %462 = vmatpush1.msra.mxu0 %v383_v24  ;;  %854 = vmatpush3.msra.mxu1 %v600_v4  ;;  %v613_v9 = vld [vmem:[%s1384_s13 + $0xe0] sm:$0xff]  ;;  %v612_v11 = vld [vmem:[%s1384_s13 + $0xd8] sm:$0xff]  ;;  %v611_v13 = vld [vmem:[%s1384_s13 + $0xd0] sm:$0xff] }
  0x9c   : > { %463 = vmatprep.subr.mxu0 %v382_v26  ;;  %855 = vmatprep.subr.mxu1 %v615_v5  ;;  %v597_v10 = vld [vmem:[%s1384_s13 + $0x60] sm:$0xff]  ;;  %v596_v12 = vld [vmem:[%s1384_s13 + $0x58] sm:$0xff]  ;;  %v595_v14 = vld [vmem:[%s1384_s13 + $0x50] sm:$0xff] }
  0x9d   : > { %464 = vmatpush1.msra.mxu0 %v381_v27  ;;  %856 = vmatpush3.msra.mxu1 %v599_v6  ;;  %v610_v15 = vld [vmem:[%s1384_s13 + $0xc8] sm:$0xff]  ;;  %v609_v17 = vld [vmem:[%s1384_s13 + $0xc0] sm:$0xff]  ;;  %v608_v19 = vld [vmem:[%s1384_s13 + $0xb8] sm:$0xff] }
  0x9e   : > { %465 = vmatprep.subr.mxu0 %v380_v28  ;;  %857 = vmatprep.subr.mxu1 %v614_v7  ;;  %v594_v16 = vld [vmem:[%s1384_s13 + $0x48] sm:$0xff]  ;;  %v593_v18 = vld [vmem:[%s1384_s13 + $0x40] sm:$0xff]  ;;  %v592_v20 = vld [vmem:[%s1384_s13 + $0x38] sm:$0xff] }
  0x9f   : > { %466 = vmatpush1.msra.mxu0 %v379_v29  ;;  %858 = vmatpush3.msra.mxu1 %v598_v8  ;;  %v607_v21 = vld [vmem:[%s1384_s13 + $0xb0] sm:$0xff]  ;;  %v606_v23 = vld [vmem:[%s1384_s13 + $0xa8] sm:$0xff]  ;;  %v605_v25 = vld [vmem:[%s1384_s13 + $0xa0] sm:$0xff] }
  0xa0   : > { %467 = vmatprep.subr.mxu0 %v378_v30  ;;  %859 = vmatprep.subr.mxu1 %v613_v9  ;;  %v591_v22 = vld [vmem:[%s1384_s13 + $0x30] sm:$0xff]  ;;  %v590_v24 = vld [vmem:[%s1384_s13 + $0x28] sm:$0xff]  ;;  %v589_v26 = vld [vmem:[%s1384_s13 + $0x20] sm:$0xff] }
  0xa1   : > { %468 = vmatpush1.msra.mxu0 %v377_v31  ;;  %860 = vmatpush3.msra.mxu1 %v597_v10  ;;  %v604_v27 = vld [vmem:[%s1384_s13 + $0x98] sm:$0xff]  ;;  %v603_v29 = vld [vmem:[%s1384_s13 + $0x90] sm:$0xff]  ;;  %v602_v31 = vld [vmem:[%s1384_s13 + $0x88] sm:$0xff]  ;;  %v556_v10 = vlaneseq }
  0xa2   : > { %469 = vmatprep.subr.mxu0 %v376_v32  ;;  %861 = vmatprep.subr.mxu1 %v612_v11  ;;  %v588_v28 = vld [vmem:[%s1384_s13 + $0x18] sm:$0xff]  ;;  %v587_v30 = vld [vmem:[%s1384_s13 + $0x10] sm:$0xff]  ;;  %v586_v32 = vld [vmem:[%s1384_s13 + $0x8] sm:$0xff] }
  0xa3   : > { %470 = vmatpush1.msra.mxu0 %v375_v33  ;;  %862 = vmatpush3.msra.mxu1 %v596_v12  ;;  %v601_v33 = vld [vmem:[%s1384_s13 + $0x80] sm:$0xff]  ;;  %v557_v12 = vshrl.u32 %v556_v10, 7 }
  0xa4   : > { %471 = vmatprep.subr.mxu0 %v438_v34  ;;  %863 = vmatprep.subr.mxu1 %v611_v13  ;;  %v585_v34 = vld [vmem:[%s1384_s13] sm:$0xff] }
  0xa5   : > { %472 = vmatpush2.msra.mxu0 %v437_v35  ;;  %864 = vmatpush3.msra.mxu1 %v595_v14  ;;  %v558_v13 = vsub.s32 0, %v557_v12  ;;  %v554_v14 = vld [vmem:[%s1382_s20] sm:$0x3] }
  0xa6   : > { %473 = vmatprep.subr.mxu0 %v436_v36  ;;  %865 = vmatprep.subr.mxu1 %v610_v15  ;;  %v562_v15 = vsub.s32 1, %v557_v12 }
  0xa7   : > { %474 = vmatpush2.msra.mxu0 %v435_v37  ;;  %866 = vmatpush3.msra.mxu1 %v594_v16 }
  0xa8   : > { %475 = vmatprep.subr.mxu0 %v434_v38  ;;  %867 = vmatprep.subr.mxu1 %v609_v17  ;;  %v559_v17 = vrot.slane %v554_v14, %v558_v13 }
  0xa9   : > { %476 = vmatpush2.msra.mxu0 %v433_v39  ;;  %868 = vmatpush3.msra.mxu1 %v593_v18 }
  0xaa   : > { %477 = vmatprep.subr.mxu0 %v432_v40  ;;  %869 = vmatprep.subr.mxu1 %v608_v19  ;;  %v568_v19 = vld [vmem:[%s365_s21] sm:$0x3] }
  0xab   : > { %478 = vmatpush2.msra.mxu0 %v431_v41  ;;  %870 = vmatpush3.msra.mxu1 %v592_v20 }
  0xac   : > { %479 = vmatprep.subr.mxu0 %v430_v42  ;;  %871 = vmatprep.subr.mxu1 %v607_v21 }
  0xad   : > { %480 = vmatpush2.msra.mxu0 %v429_v43  ;;  %872 = vmatpush3.msra.mxu1 %v591_v22  ;;  %v563_v22 = vrot.slane %v554_v14, %v562_v15 }
  0xae   : > { %481 = vmatprep.subr.mxu0 %v428_v44  ;;  %873 = vmatprep.subr.mxu1 %v606_v23 }
  0xaf   : > { %482 = vmatpush2.msra.mxu0 %v427_v45  ;;  %874 = vmatpush3.msra.mxu1 %v590_v24  ;;  %v573_v24 = vrot.slane %v568_v19, %v558_v13 }
  0xb0   : > { %483 = vmatprep.subr.mxu0 %v426_v46  ;;  %875 = vmatprep.subr.mxu1 %v605_v25 }
  0xb1   : > { %484 = vmatpush2.msra.mxu0 %v425_v47  ;;  %876 = vmatpush3.msra.mxu1 %v589_v26 }
  0xb2   : > { %485 = vmatprep.subr.mxu0 %v424_v48  ;;  %877 = vmatprep.subr.mxu1 %v604_v27  ;;  %v577_v27 = vrot.slane %v568_v19, %v562_v15 }
  0xb3   : > { %486 = vmatpush2.msra.mxu0 %v423_v49  ;;  %878 = vmatpush3.msra.mxu1 %v588_v28 }
  0xb4   : > { %487 = vmatprep.subr.mxu0 %v422_v50  ;;  %879 = vmatprep.subr.mxu1 %v603_v29 }
  0xb5   : > { %488 = vmatpush2.msra.mxu0 %v421_v51  ;;  %880 = vmatpush3.msra.mxu1 %v587_v30 }
  0xb6   : > { %489 = vmatprep.subr.mxu0 %v420_v52  ;;  %881 = vmatprep.subr.mxu1 %v602_v31 }
  0xb7   : > { %490 = vmatpush2.msra.mxu0 %v419_v53  ;;  %882 = vmatpush3.msra.mxu1 %v586_v32 }
  0xb8   : > { %491 = vmatprep.subr.mxu0 %v418_v54  ;;  %883 = vmatprep.subr.mxu1 %v601_v33 }
  0xb9   : > { %492 = vmatpush2.msra.mxu0 %v417_v55  ;;  %884 = vmatpush3.msra.mxu1 %v585_v34  ;;  %v584_v34 = vld [vmem:[#allocation10] sm:$0xff] }
  0xba   : > { %493 = vmatprep.subr.mxu0 %v416_v56 }
  0xbb   : > { %494 = vmatpush2.msra.mxu0 %v415_v57 }
  0xbc   : > { %495 = vmatprep.subr.mxu0 %v414_v58 }
  0xbd   : > { %496 = vmatpush2.msra.mxu0 %v413_v59 }
  0xbe   : > { %497 = vmatprep.subr.mxu0 %v412_v60 }
  0xbf   : > { %498 = vmatpush2.msra.mxu0 %v411_v61 }
  0xc0   : > { %499 = vmatprep.subr.mxu0 %v410_v62 }
  0xc1   : > { %500 = vmatpush2.msra.mxu0 %v409_v63 }
  0xc2   : > { %501 = vmatprep.subr.mxu0 %v408_v0 }
  0xc3   : > { %502 = vmatpush2.msra.mxu0 %v407_v1 }
  0xc4   : > { %504 = vmatmul.mubr.f32.vlgmr.msra.gmra.mxu0 %v373_v2 }
 0x184   : > { %v505_v35 = vpop.f32.mrf.mxu0 }
 0x185   : > { %v510_v36 = vrot.slane %v505_v35, 4  ;;  %v524_v37 = vmul.f32 %v505_v35, %v505_v35 }
 0x186   : > { %v507_v38 = vpop.f32.mrf.mxu0 }
 0x187   : > { %v511_v39 = vadd.f32 %v510_v36, %v505_v35  ;;  %v526_v40 = vrot.slane %v524_v37, 4  ;;  %v516_v41 = vrot.slane %v507_v38, 4  ;;  %v525_v42 = vmul.f32 %v507_v38, %v507_v38 }
 0x189   : > { %v512_v43 = vrot.slane %v511_v39, 2  ;;  %v527_v44 = vadd.f32 %v526_v40, %v524_v37  ;;  %v517_v45 = vadd.f32 %v516_v41, %v507_v38  ;;  %v532_v46 = vrot.slane %v525_v42, 4 }
 0x18b   : > { %v513_v47 = vadd.f32 %v512_v43, %v511_v39  ;;  %v528_v48 = vrot.slane %v527_v44, 2  ;;  %v518_v49 = vrot.slane %v517_v45, 2  ;;  %v533_v50 = vadd.f32 %v532_v46, %v525_v42 }
 0x18d   : > { %v514_v51 = vrot.slane %v513_v47, 1  ;;  %v529_v52 = vadd.f32 %v528_v48, %v527_v44  ;;  %v519_v53 = vadd.f32 %v518_v49, %v517_v45  ;;  %v534_v54 = vrot.slane %v533_v50, 2 }
 0x18f   : > { %v515_v55 = vadd.f32 %v514_v51, %v513_v47  ;;  %v530_v56 = vrot.slane %v529_v52, 1  ;;  %v520_v57 = vrot.slane %v519_v53, 1  ;;  %v535_v58 = vadd.f32 %v534_v54, %v533_v50 }
 0x191   : > { %v522_v59 = vmul.f32 0.125, %v515_v55  ;;  %v531_v60 = vadd.f32 %v530_v56, %v529_v52  ;;  %v521_v61 = vadd.f32 %v520_v57, %v519_v53  ;;  %v536_v62 = vrot.slane %v535_v58, 1 }
 0x193   : > { %v538_v63 = vmul.f32 0.125, %v531_v60  ;;  %v540_v0 = vmul.f32 %v522_v59, %v522_v59  ;;  %v523_v1 = vmul.f32 0.125, %v521_v61  ;;  %v537_v2 = vadd.f32 %v536_v62, %v535_v58 }
 0x194   : > { %v546_v16 = vsub.f32 %v505_v35, %v522_v59 }
 0x195   : > { %v542_v3 = vsub.f32 %v538_v63, %v540_v0  ;;  %v541_v4 = vmul.f32 %v523_v1, %v523_v1  ;;  %v539_v5 = vmul.f32 0.125, %v537_v2  ;;  %v547_v21 = vsub.f32 %v507_v38, %v523_v1 }
 0x197   : > { %v544_v6 = vmax.f32 %v542_v3, 0.0  ;;  %v543_v7 = vsub.f32 %v539_v5, %v541_v4 }
 0x199   : > { %v548_v8 = vadd.f32 1e-05, %v544_v6  ;;  %v545_v9 = vmax.f32 %v543_v7, 0.0 }
 0x19b   : > { %961 = vrsqrt.f32 %v548_v8  ;;  %v549_v11 = vadd.f32 1e-05, %v545_v9 }
 0x19d   : > { %963 = vrsqrt.f32 %v549_v11 }
 0x1a8   : > { %v962_v18 = vpop.eup %961 }
 0x1a9   : > { %v552_v20 = vmul.f32 %v962_v18, %v546_v16 }
 0x1aa   : > { %v964_v23 = vpop.eup %963 }
 0x1ab   : > { %v566_v25 = vmul.f32 %v559_v17, %v552_v20  ;;  %v553_v26 = vmul.f32 %v964_v23, %v547_v21 }
 0x1ad   : > { %v567_v28 = vmul.f32 %v563_v22, %v553_v26  ;;  %v580_v29 = vadd.f32 %v573_v24, %v566_v25 }
 0x1af   : > { %v581_v30 = vadd.f32 %v577_v27, %v567_v28  ;;  %v582_v32 = vmax.f32 %v580_v29, 0.0 }
 0x1b1   : > { %v583_v31 = vmax.f32 %v581_v30, 0.0 }
 0x1b3   : > { %681 = vmatprep.mubr.f32.mxu1 %v583_v31 }
 0x1b4   : > { %682 = vmatmul.mubr.f32.vlgmr.msra.gmra.mxu1 %v582_v32 }
 0x274   : > { %v885_v33 = vpop.f32.mrf.mxu1 }
 0x276   : > { %v886_v35 = vpop.f32.mrf.mxu1 }
 0x277   : > { %v887_v36 = vadd.f32 %v886_v35, %v885_v33  ;;  %692 = sbr.rel (%p844_p11) target bundleno = 646 (0x286), region = 68 }
 0x279   : > { %v687_v37 = vadd.f32 %v887_v36, %v584_v34 }
 0x27b   : > { %688 = vst [vmem:[#allocation10] sm:$0xff] %v687_v37 }
 0x27c   : > { %v845_v39 = vld [vmem:[%s1535_s5] ss:$0 sm:$0xff] }
 0x282   : > { %v693_v38 = vld [vmem:[#allocation10] sm:$0xff] }
 0x283   : > { %v701_v40 = vadd.f32 %v845_v39, %v693_v38 }
 0x285   : > { %702 = vst [vmem:[#allocation10] sm:$0xff] %v701_v40 }
 0x286 PF: > { %p919_p3 = scmp.eq.s32.totalorder %s1273_s18, 1  ;;  %s1157_s16 = smov [#allocation10]  }
 0x287   : > { %s710_s17 = sshll.u32 %s1157_s16, 4  ;;  %s711_s17 = int_to_ptr.vmem [resolvable:$true] %s710_s17 }
 0x288   : > { %s1075_s15 = scalar_lea.vmem %s711_s17, 128  ;;  %p1082_p4 = scmp.lt.s32.totalorder %s711_s17, %s711_s17 }
 0x289   : > { %p1076_p10 = scmp.ne.s32.totalorder %s711_s17, %s1075_s15  ;;  %p1083_p13 = scmp.lt.s32.totalorder %s1075_s15, %s1075_s15 }
 0x28b   : > { %p1077_p12 = pnand %p1076_p10, %p919_p3  ;;  %p1084_p1 = por %p1083_p13, %p1082_p4 }
 0x28d   : > { %p1078_p2 = pneg %p1077_p12 }
 0x28f   : > { %p1085_p7 = pnand %p1084_p1, %p1078_p2 }
 0x291   : > { %1088 = shalt.err (!%p1085_p7)
}
 0x292   : > { %899 = dma.vmem_to_hbm [thread:$0]  (%p919_p3), %s711_s17, 128, %s1536_s6, [#allocation4]  }
 0x293   : > { %1128 = dma.done.wait (%p919_p3), [#allocation4], 128  }
 0x294   : > { %1130 = vsyncadd (%p919_p3), [#allocation4], 4294967168 }
 0x295 PF: > { %p21_p6 = scmp.ge.s32.totalorder %s1214_s25, 4   ;;  %s1550_s21 = smov %s1137_s22 }
 0x296   : > { %s1551_s22 = smov %s1141_s23  ;;  %s1552_s23 = smov %s1224_s28 }
 0x297   : > { %s1553_s24 = smov %s1214_s25  ;;  %23 = sbr.rel (!%p21_p6) target bundleno = 7 (0x7), region = 121 }
 0x29c   :  { %723 = vsyncpa [#allocation3], 1 }
 0x29d   :  { %725 = vsyncpa [#allocation3 + $0x1], 1 }
 0x29e   :  { %726 = vsyncpa [#allocation6], 1 }
 0x29f   :  { %728 = vsyncpa [#allocation6 + $0x1], 1 }
 0x2a0   :  { %729 = vsyncpa [#allocation9], 1 }
 0x2a1   :  { %731 = vsyncpa [#allocation9 + $0x1], 1 }
 0x2a2   :  { %732 = vsyncpa [#allocation4], 1 }
 0x2a3   :  { %734 = vsyncpa [#allocation4 + $0x1], 1 }

</bundles_post_ra>
